<compile_context>
chip_gen: v7x
topology: tpu7x:2x2x1
jax: 0.10.0
libtpu: 0.0.40
codegen_flags: <defaults>
</compile_context>

<pallas_src>
import functools
import math

import numpy as np
import jax
import jax.numpy as jnp
from jax.experimental import pallas as pl
from jax.experimental.pallas import tpu as pltpu


# ---------------------------------------------------------------------------
# Static sorting-network generation (baked into the kernels).
# ---------------------------------------------------------------------------
def _odd_even_pairs(n):
    """Odd-even transposition network (ascending)."""
    pairs = []
    for phase in range(n):
        for k in range(phase % 2, n - 1, 2):
            pairs.append((k, k + 1, True))
    return tuple(pairs)


def _bitonic_pairs(n):
    """Bitonic network (ascending), power-of-two n."""
    pairs = []
    k = 2
    while k <= n:
        j = k // 2
        while j >= 1:
            for i in range(n):
                partner = i ^ j
                if partner > i:
                    pairs.append((i, partner, (i & k) == 0))
            j //= 2
        k *= 2
    return tuple(pairs)


def _pairs_network(n):
    if n >= 8 and (n & (n - 1)) == 0:
        return _bitonic_pairs(n)
    return _odd_even_pairs(n)


def _roll_stages(n):
    """Stages for the full-row roll formulation.

    ("b", j, k): bitonic stage (partner distance j members, direction bit k).
    ("o", 1, p): odd-even transposition phase with parity p.
    """
    if (n & (n - 1)) == 0:
        stages = []
        k = 2
        while k <= n:
            j = k // 2
            while j >= 1:
                stages.append(("b", j, k))
                j //= 2
            k *= 2
        return tuple(stages)
    return tuple(("o", 1, p % 2) for p in range(n))


# ---------------------------------------------------------------------------
# Kernels
# ---------------------------------------------------------------------------
def _group_sort_slab_kernel(x_ref, o_ref, *, group_size, seg, pairs):
    """Segment-slice compare-exchange network (lane-dense when seg % 128 == 0)."""
    vals = [x_ref[:, k * seg:(k + 1) * seg] for k in range(group_size)]
    # TODO(synk): NaN inputs propagate through min/max rather than sorting to
    # the end as torch.sort would; exact only for non-NaN data.
    for a, b, asc in pairs:
        lo = jnp.minimum(vals[a], vals[b])
        hi = jnp.maximum(vals[a], vals[b])
        vals[a], vals[b] = (lo, hi) if asc else (hi, lo)
    for k in range(group_size):
        o_ref[:, k * seg:(k + 1) * seg] = vals[k]


def _group_sort_roll_kernel(m_ref, x_ref, o_ref, *, group_size, seg, width,
                            stages, descending):
    """Full-width-vreg network: pltpu.roll partners + periodic member masks.

    m_ref holds the member index of every lane (period W_row, precomputed on
    host) so no vector integer division is needed in-kernel.  All loads/stores
    are lane-dense and unmasked because `width` is a multiple of 128.
    """
    m = m_ref[...]          # (1, width) int32 member index per lane
    x = x_ref[...]
    # TODO(synk): for group_size >= 8 on v7x this chain can become vector
    # ld/st-slot bound; strip-mining into vreg-resident panels would help.
    for kind, j, kk in stages:
        dist = j * seg
        down = pltpu.roll(x, width - dist, 1)   # down[L] = x[L + dist]
        up = pltpu.roll(x, dist, 1)             # up[L]   = x[L - dist]
        if kind == "b":                          # bitonic stage
            is_low = (m & j) == 0                # partner is `dist` lanes ahead
            asc = (m & kk) == 0
            if descending:
                asc = jnp.logical_not(asc)
            partner = jnp.where(is_low, down, up)
            take_min = is_low == asc
            x = jnp.where(take_min, jnp.minimum(x, partner),
                          jnp.maximum(x, partner))
        else:                                    # odd-even phase, parity kk
            par = kk
            is_lo = ((m & 1) == par) & (m < group_size - 1)
            is_hi = ((m & 1) != par) & (m >= 1)
            x = jnp.where(is_lo, jnp.minimum(x, down),
                          jnp.where(is_hi, jnp.maximum(x, up), x))
    o_ref[...] = x


# ---------------------------------------------------------------------------
# Wrapper
# ---------------------------------------------------------------------------
def _round_up(x, m):
    return (x + m - 1) // m * m


def _sublane_multiple(dtype):
    # Sublane packing per vreg: 8 for 32-bit, 16 for bf16, 32 for int8.
    return max(8, 32 // jnp.dtype(dtype).itemsize)


_TARGET_TILE_BYTES = 4 * 1024 * 1024   # ~4 MiB/step: >=85% of HBM roofline on
                                       # v5e/v6e, amortizes the ~0.35us per-step
                                       # overhead under v7x's 3.2 TB/s HBM.
_MAX_TILE_BYTES = 4 * 1024 * 1024      # cap (also applied to user block_rows)
_VMEM_CAP_BYTES = 40 * 1024 * 1024     # leave >=24 MiB headroom on v7x (64 MiB)


def group_sort_pallas(x, group_size, axis=-1, new_impl=False, *, block_rows=None):
    orig_shape = x.shape
    ndim = x.ndim
    ax = axis + ndim if axis < 0 else axis
    C = orig_shape[ax]
    if C % group_size != 0:
        raise ValueError("channels must be divisible by group_size")
    if group_size == 1:
        return x
    G = group_size

    # Flatten to (P, W_row): the group members become contiguous segments of
    # width S inside each row, independent of where `axis` sits.  Pure reshape.
    P = math.prod(orig_shape[:ax])
    T = math.prod(orig_shape[ax + 1:])
    S = (C // G) * T
    W_row = G * S

    # Row coalescing so the lane (last) dim is a multiple of 128 when possible.
    r = 1
    if W_row % 128 != 0:
        r0 = 128 // math.gcd(W_row, 128)
        if P % r0 == 0:
            r = r0
    M = P // r
    W = r * W_row

    x2 = x.reshape(M, W)                 # free row-major reshape, no transpose
    dtype = x2.dtype
    itemsize = jnp.dtype(dtype).itemsize
    sub = _sublane_multiple(dtype)
    row_bytes = W * itemsize

    if block_rows is None:
        block_rows = max(sub, (_TARGET_TILE_BYTES // max(1, row_bytes)) // sub * sub)
    block_rows = _round_up(max(1, int(block_rows)), sub)
    block_rows = min(block_rows, _round_up(M, sub))
    cap_rows = max(sub, (_MAX_TILE_BYTES // max(1, row_bytes)) // sub * sub)
    block_rows = max(sub, min(block_rows, cap_rows))

    # Large inputs: ensure >= 4 grid steps so both v7x TensorCores get >= 2
    # pipelined blocks; small inputs keep 1 block (no pointless split on the
    # single-TensorCore v5e/v6e).
    total_bytes = M * row_bytes
    if total_bytes >= (2 << 20) and M >= 4 * sub:
        block_rows = min(block_rows, max(sub, _round_up(pl.cdiv(M, 4), sub)))

    n_blocks = pl.cdiv(M, block_rows)    # ragged last block masked by Pallas
    tile_bytes = block_rows * row_bytes
    # in/out double buffering (4x tile) + elementwise intermediates + margin.
    vmem_limit = int(min(_VMEM_CAP_BYTES,
                         max(16 * 1024 * 1024, 8 * tile_bytes + (2 << 20))))

    descending = bool(new_impl and G == 2)     # torch only special-cases G == 2
    use_roll = (S % 128 != 0) and (W % 128 == 0)

    compiler_params = pltpu.CompilerParams(
        dimension_semantics=("parallel",),
        vmem_limit_bytes=vmem_limit,
    )
    out_shape = jax.ShapeDtypeStruct((M, W), dtype)
    in_x_spec = pl.BlockSpec((block_rows, W), lambda i: (i, 0))
    out_spec = pl.BlockSpec((block_rows, W), lambda i: (i, 0))

    if use_roll:
        member = ((np.arange(W) % W_row) // S).astype(np.int32)[None, :]
        kern = functools.partial(
            _group_sort_roll_kernel, group_size=G, seg=S, width=W,
            stages=_roll_stages(G), descending=descending)
        out = pl.pallas_call(
            kern,
            out_shape=out_shape,
            grid=(n_blocks,),
            in_specs=[pl.BlockSpec((1, W), lambda i: (0, 0)), in_x_spec],
            out_specs=out_spec,
            compiler_params=compiler_params,
        )(jnp.asarray(member), x2)
    else:
        pairs = ((0, 1, False),) if descending else _pairs_network(G)
        kern = functools.partial(
            _group_sort_slab_kernel, group_size=G, seg=S, pairs=pairs)
        out = pl.pallas_call(
            kern,
            out_shape=out_shape,
            grid=(n_blocks,),
            in_specs=[in_x_spec],
            out_specs=out_spec,
            compiler_params=compiler_params,
        )(x2)

    return out.reshape(orig_shape)


# ---------------------------------------------------------------------------
# Pure-JAX reference mirroring the torch view/sort/view semantics.
# ---------------------------------------------------------------------------
def group_sort_reference(x, group_size, axis=-1, new_impl=False):
    if axis < 0:
        axis += x.ndim
    shape = list(x.shape)
    C = shape[axis]
    chunk = C // group_size
    xv = x.reshape(shape[:axis] + [group_size, chunk] + shape[axis + 1:])
    xs = jnp.sort(xv, axis=axis)
    if new_impl and group_size == 2:
        xs = jnp.flip(xs, axis=axis)      # torch new_impl: [max, min] order
    return xs.reshape(shape)


if __name__ == "__main__":
    key = jax.random.PRNGKey(0)
    keys = jax.random.split(key, 6)

    # Primary snorm case: (batch=8, hidden=32), group_size=2.
    # Roll path, rows coalesced 4x -> lane-dense 128-wide unmasked stores.
    x0 = jax.random.normal(keys[0], (8, 32), dtype=jnp.float32)
    out0 = jax.block_until_ready(group_sort_pallas(x0, 2))
    assert out0.shape == x0.shape and out0.dtype == x0.dtype
    assert jnp.allclose(out0, group_sort_reference(x0, 2)), "mismatch gs=2"

    # new_impl=True (descending pair order), group_size=2.
    out0n = jax.block_until_ready(group_sort_pallas(x0, 2, new_impl=True))
    assert jnp.allclose(out0n, group_sort_reference(x0, 2, new_impl=True)), \
        "mismatch new_impl"

    # Masked fallback path (P=21 not divisible by coalescing factor), gs=4, 3-D.
    x1 = jax.random.normal(keys[1], (3, 7, 64), dtype=jnp.float32)
    out1 = jax.block_until_ready(group_sort_pallas(x1, 4))
    assert jnp.allclose(out1, group_sort_reference(x1, 4)), "mismatch gs=4"

    # Roll path with multi-vreg rows (W=256) and bitonic network, gs=8.
    x2 = jax.random.normal(keys[2], (16, 256), dtype=jnp.float32)
    out2 = jax.block_until_ready(group_sort_pallas(x2, 8))
    assert jnp.allclose(out2, group_sort_reference(x2, 8)), "mismatch gs=8"

    # Non-last axis (axis=1): handled by a pure reshape (no transpose), gs=3.
    x3 = jax.random.normal(keys[3], (2, 12, 5), dtype=jnp.float32)
    out3 = jax.block_until_ready(group_sort_pallas(x3, 3, axis=1))
    assert jnp.allclose(out3, group_sort_reference(x3, 3, axis=1)), "mismatch axis=1"

    # Roll path + odd-even network (non-power-of-two gs) with coalesced rows.
    x4 = jax.random.normal(keys[4], (8, 96), dtype=jnp.float32)
    out4 = jax.block_until_ready(group_sort_pallas(x4, 3))
    assert jnp.allclose(out4, group_sort_reference(x4, 3)), "mismatch gs=3"

    # Lane-aligned segment path (S == 128), gs=4.
    x5 = jax.random.normal(keys[5], (4, 512), dtype=jnp.float32)
    out5 = jax.block_until_ready(group_sort_pallas(x5, 4))
    assert jnp.allclose(out5, group_sort_reference(x5, 4)), "mismatch gs=4 aligned"

    print("KERNEL_OK")
</pallas_src>

<mosaic_0001>
module attributes {stable_mosaic.version = 11 : i64} {
  func.func @_group_sort_roll_kernel(%arg0: i32, %arg1: memref<1x128xi32, #tpu.memory_space<vmem>>, %arg2: memref<8x128xf32, #tpu.memory_space<vmem>>, %arg3: memref<8x128xf32, #tpu.memory_space<vmem>>) attributes {dimension_semantics = [#tpu.dimension_semantics<parallel>], iteration_bounds = array<i64: 1>, scalar_prefetch = 0 : i64, scratch_operands = 0 : i64, tpu.core_type = #tpu.core_type<tc>, window_params = [{pipeline_mode = #tpu.pipeline_mode<synchronous>, transform_indices = @transform_0, window_bounds = array<i64: 1, 128>}, {transform_indices = @transform_1, window_bounds = array<i64: 8, 128>}, {transform_indices = @transform_2, window_bounds = array<i64: 8, 128>}]} {
    %c0 = arith.constant 0 : index
    %c0_0 = arith.constant 0 : index
    %0 = vector.load %arg1[%c0, %c0_0] : memref<1x128xi32, #tpu.memory_space<vmem>>, vector<1x128xi32>
    %c0_1 = arith.constant 0 : index
    %c0_2 = arith.constant 0 : index
    %1 = vector.load %arg2[%c0_1, %c0_2] : memref<8x128xf32, #tpu.memory_space<vmem>>, vector<8x128xf32>
    %c112_i32 = arith.constant 112 : i32
    %2 = tpu.dynamic_rotate %1 by %c112_i32 dim 1 : vector<8x128xf32>, i32 -> vector<8x128xf32>
    %c16_i32 = arith.constant 16 : i32
    %3 = tpu.dynamic_rotate %1 by %c16_i32 dim 1 : vector<8x128xf32>, i32 -> vector<8x128xf32>
    %c1_i32 = arith.constant 1 : i32
    %4 = vector.broadcast %c1_i32 : i32 to vector<1x128xi32>
    %5 = arith.andi %0, %4 : vector<1x128xi32>
    %c0_i32 = arith.constant 0 : i32
    %6 = vector.broadcast %c0_i32 : i32 to vector<1x128xi32>
    %7 = arith.cmpi eq, %5, %6 : vector<1x128xi32>
    %c2_i32 = arith.constant 2 : i32
    %8 = vector.broadcast %c2_i32 : i32 to vector<1x128xi32>
    %9 = arith.andi %0, %8 : vector<1x128xi32>
    %c0_i32_3 = arith.constant 0 : i32
    %10 = vector.broadcast %c0_i32_3 : i32 to vector<1x128xi32>
    %11 = arith.cmpi eq, %9, %10 : vector<1x128xi32>
    %12 = vector.shape_cast %7 : vector<1x128xi1> to vector<1x128xi1>
    %13 = vector.broadcast %12 : vector<1x128xi1> to vector<8x128xi1>
    %14 = arith.select %13, %2, %3 : vector<8x128xi1>, vector<8x128xf32>
    %15 = arith.xori %7, %11 : vector<1x128xi1>
    %cst = arith.constant dense<true> : vector<1x128xi1>
    %16 = arith.xori %15, %cst : vector<1x128xi1>
    %17 = arith.minimumf %1, %14 : vector<8x128xf32>
    %18 = arith.maximumf %1, %14 : vector<8x128xf32>
    %19 = vector.shape_cast %16 : vector<1x128xi1> to vector<1x128xi1>
    %20 = vector.broadcast %19 : vector<1x128xi1> to vector<8x128xi1>
    %21 = arith.select %20, %17, %18 : vector<8x128xi1>, vector<8x128xf32>
    %c0_4 = arith.constant 0 : index
    %c0_5 = arith.constant 0 : index
    %22 = vector.load %arg3[%c0_4, %c0_5] : memref<8x128xf32, #tpu.memory_space<vmem>>, vector<8x128xf32>
    tpu.vector_store %arg3[%c0_4, %c0_5], %21 {strides = array<i32>} : memref<8x128xf32, #tpu.memory_space<vmem>>, vector<8x128xf32>,
    return
  }
  func.func @transform_0(%arg0: i32) -> (i32, i32) {
    %c0_i32 = arith.constant 0 : i32
    %c0_i32_0 = arith.constant 0 : i32
    %c0_i32_1 = arith.constant 0 : i32
    return %c0_i32, %c0_i32_0 : i32, i32
  }
  func.func @transform_1(%arg0: i32) -> (i32, i32) {
    %c0_i32 = arith.constant 0 : i32
    %c0_i32_0 = arith.constant 0 : i32
    return %arg0, %c0_i32 : i32, i32
  }
  func.func @transform_2(%arg0: i32) -> (i32, i32) {
    %c0_i32 = arith.constant 0 : i32
    %c0_i32_0 = arith.constant 0 : i32
    return %arg0, %c0_i32 : i32, i32
  }
}

</mosaic_0001>

<bundles_post_ra>
// kernel: tpu_custom_call.1
= control target key start
LH: loop header
LB: loop body
LE: loop exit
PB: predicated region body
PF: predicated region fallthrough
CT: control target
= control target key end

     0   :  { %7 = vsyncpa [#allocation3], 0  ;;  %s176_s0 = inlined_call_operand.hbm [shape: s32[1,128], index: 0, kind: input, shape index: {}]   ;;  %s177_s1 = inlined_call_operand.vmem [shape: f32[2,128], index: 1, kind: input, shape index: {}]   ;;  %s178_s2 = inlined_call_operand.hbm [shape: f32[2,128], index: 2, kind: output, shape index: {}]  }
   0x1   :  { %8 = vsyncpa [#allocation4], 0  ;;  %s126_s9 = smov [#allocation2]   ;;  %s78_s13 = scalar_lea.hbm %s176_s0, 16 }
   0x2   :  { %s15_s10 = sshll.u32 %s126_s9, 4  ;;  %p79_p0 = scmp.ne.s32.totalorder %s176_s0, %s78_s13  ;;  %s16_s10 = int_to_ptr.vmem [resolvable:$true] %s15_s10 }
   0x3   :  { %p82_p1 = scmp.lt.u32.totalorder %s78_s13, %s176_s0 }
   0x5   :  { %p84_p2 = pnand %p82_p1, %p79_p0 }
   0x7   :  { %87 = shalt.err (!%p84_p2)
}
   0x8   :  { %s88_s18 = scalar_lea.vmem %s16_s10, 16  ;;  %s92_s19 = scalar_lea.vmem %s16_s10, 32 }
   0x9   :  { %p89_p3 = scmp.ne.s32.totalorder %s16_s10, %s88_s18  ;;  %p93_p4 = scmp.lt.s32.totalorder %s16_s10, %s16_s10 }
   0xa   :  { %p94_p5 = scmp.lt.s32.totalorder %s92_s19, %s88_s18 }
   0xc   :  { %p95_p6 = por %p94_p5, %p93_p4 }
   0xe   :  { %p96_p7 = pnand %p95_p6, %p89_p3 }
  0x10   :  { %99 = shalt.err (!%p96_p7)
}
  0x11   :  { %18 = dma.hbm_to_vmem [thread:$0]  %s176_s0, 16, %s16_s10, [#allocation3]  }
  0x12   :  { %122 = dma.done.wait [#allocation3], 16  }
  0x13   :  { %123 = vsyncadd [#allocation3], 4294967280  ;;  %v25_v0 = vld [vmem:[%s177_s1] sm:$0xff]  ;;  %s127_s24 = smov 112   ;;  %s128_s25 = smov 16   ;;  %v35_v4 = vlaneseq  ;;  %v129_v7 = vmov 0  }
  0x14   :  { %26 = vrot.lane.b32.xlu0 %v25_v0, %s127_s24  ;;  %v24_v1 = vld [vmem:[#allocation2] sm:$0x1]  ;;  %vm130_vm3 = vmmov 1  }
  0x15   :  { %v30_v2 = vand.u32 1, %v24_v1  ;;  %v32_v3 = vand.u32 2, %v24_v1  ;;  %v36_v5 = vshrl.u32 %v35_v4, 7 }
  0x17   :  { %vm31_vm0 = vcmp.eq.s32.totalorder %v30_v2, 0  ;;  %vm33_vm1 = vcmp.eq.s32.totalorder %v32_v3, 0  ;;  %v37_v6 = vsub.s32 0, %v36_v5 }
  0x18   :  { %28 = vrot.lane.b32.xlu0 %v25_v0, %s128_s25  ;;  %vm41_vm2 = vmxor %vm31_vm0, %vm33_vm1  ;;  %v34_v8 = vsel %vm31_vm0, 1, %v129_v7 }
  0x19   :  { %vm42_vm4 = vmxor %vm41_vm2, %vm130_vm3  ;;  %v38_v9 = vrot.slane %v34_v8, %v37_v6 }
  0x1a   :  { %v45_v10 = vsel %vm42_vm4, 1, %v129_v7 }
  0x1b   :  { %v49_v12 = vrot.slane %v45_v10, %v37_v6  ;;  %vm39_vm5 = vcmp.eq.s32.totalorder %v38_v9, 1 }
  0x1d   :  { %vm50_vm6 = vcmp.eq.s32.totalorder %v49_v12, 1 }
  0x86   :  { %v27_v11 = vpop.permute.xlu0 %26 }
  0x8a   :  { %v29_v13 = vpop.permute.xlu0 %28 }
  0x8b   :  { %v40_v14 = vsel %vm39_vm5, %v27_v11, %v29_v13 }
  0x8c   :  { %v43_v15 = vmin.f32 %v25_v0, %v40_v14  ;;  %v44_v16 = vmax.f32 %v25_v0, %v40_v14 }
  0x8e   :  { %v51_v17 = vsel %vm50_vm6, %v43_v15, %v44_v16 }
  0x8f   :  { %52 = vst [vmem:[#allocation5] sm:$0xff] %v51_v17 }
  0x90   :  { %57 = vsyncadd [#allocation4], 96  ;;  %s131_s0 = smov [#allocation5]  }
  0x91   :  { %s58_s1 = sshll.u32 %s131_s0, 4  ;;  %s59_s1 = int_to_ptr.vmem [resolvable:$true] %s58_s1 }
  0x92   :  { %s100_s26 = scalar_lea.vmem %s59_s1, 32  ;;  %s104_s27 = scalar_lea.vmem %s59_s1, 128 }
  0x93   :  { %p101_p8 = scmp.ne.s32.totalorder %s59_s1, %s100_s26  ;;  %p105_p9 = scmp.lt.s32.totalorder %s59_s1, %s59_s1 }
  0x94   :  { %p106_p10 = scmp.lt.s32.totalorder %s104_s27, %s100_s26 }
  0x96   :  { %p107_p11 = por %p106_p10, %p105_p9 }
  0x98   :  { %p108_p12 = pnand %p107_p11, %p101_p8 }
  0x9a   :  { %111 = shalt.err (!%p108_p12)
}
  0x9b   :  { %s112_s30 = scalar_lea.hbm %s178_s2, 32 }
  0x9c   :  { %p113_p13 = scmp.ne.s32.totalorder %s178_s2, %s112_s30  ;;  %p116_p0 = scmp.lt.u32.totalorder %s112_s30, %s178_s2 }
  0x9e   :  { %p118_p1 = pnand %p116_p0, %p113_p13 }
  0xa0   :  { %121 = shalt.err (!%p118_p1)
}
  0xa1   :  { %s132_s7 = smov 32   ;;  %s133_s8 = smov 2  }
  0xa2   :  { %64 = dma.vmem_to_hbm [thread:$0]  %s59_s1, 32, %s178_s2, [#allocation4], %s132_s7, %s132_s7, %s133_s8  }
  0xa3   :  { %124 = dma.done.wait [#allocation4], 128  }
  0xa4   :  { %125 = vsyncadd [#allocation4], 4294967168 }
  0xa5   :  { %68 = vsyncpa [#allocation3], 1 }
  0xa6   :  { %69 = vsyncpa [#allocation4], 1 }

</bundles_post_ra>
